<compile_context>
chip_gen: v5e
topology: v5e:2x2
jax: 0.10.0
libtpu: 0.0.40
codegen_flags: <defaults>
</compile_context>

<pallas_src>
import jax
import jax.numpy as jnp
from jax.experimental import pallas as pl
from jax.experimental.pallas import tpu as pltpu

D = 128          # embed / feature dim (lane-dense: multiple of 128)
EPS = 1e-5       # torch.nn.LayerNorm default eps

_TB_CANDIDATES = (512, 256, 128, 64, 32, 16, 8)


def _choose_tb(b_padded):
    """Pick the row-tile: biggest MXU-filling tile, preferring >=2 grid steps
    so both v7x TensorCores are used (v5e/v6e single-TC unaffected)."""
    for tb in _TB_CANDIDATES:
        if b_padded % tb == 0 and b_padded >= 2 * tb:
            return tb
    for tb in _TB_CANDIDATES:
        if b_padded % tb == 0:
            return tb
    return 8


# ----------------------------------------------------------------------------
# Kernel: processes a (TB, D) block of independent rows through the full
# fused forward pass.  w_ref is the packed bf16 weight slab (D, 3D) =
# [W_attn | W1 | W2]; vec_ref is the packed f32 vector slab (8, D) with rows
# [b_attn, b1, b2, g1, be1, g2, be2, 0].
# ----------------------------------------------------------------------------
def _fused_rows_kernel(x_ref, w_ref, vec_ref, o_ref):
    x = x_ref[...]                                    # (TB, D) float32
    d = x.shape[-1]
    w = w_ref[...]                                    # (D, 3D) bfloat16 (resident)

    vecs = vec_ref[...]                               # (8, D) f32 — one vreg
    b_attn = vecs[0:1, :]
    b1, b2 = vecs[1:2, :], vecs[2:3, :]
    g1, be1 = vecs[3:4, :], vecs[4:5, :]
    g2, be2 = vecs[5:6, :], vecs[6:7, :]

    # ---- MultiheadAttention, seq_len == 1: softmax(score) == 1 -> attn == v.
    #      Wv@Wo and bv@Wo+bo were folded at pack time, so one matmul suffices.
    v1 = jnp.dot(x.astype(jnp.bfloat16), w[:, 0:d],
                 preferred_element_type=jnp.float32) + b_attn

    # ---- v2 = v1 + 0.5
    v2 = v1 + 0.5

    # ---- fc1 -> ReLU -> dropout(identity) -> residual add
    v3 = jnp.dot(v2.astype(jnp.bfloat16), w[:, d:2 * d],
                 preferred_element_type=jnp.float32) + b1
    v4 = jnp.maximum(v3, 0.0)
    # TODO(synk): Dropout(p=0.5) implemented as identity (inference semantics).
    v6 = v2 + v4                                      # torch.add(v2, 1, v5)

    # ---- layer_norm1 (all f32 elementwise)
    mu = jnp.mean(v6, axis=-1, keepdims=True)
    xc = v6 - mu
    var = jnp.mean(xc * xc, axis=-1, keepdims=True)
    v7 = xc * jax.lax.rsqrt(var + EPS) * g1 + be1

    # ---- fc2 -> tanh
    v8 = jnp.dot(v7.astype(jnp.bfloat16), w[:, 2 * d:3 * d],
                 preferred_element_type=jnp.float32) + b2
    v9 = jnp.tanh(v8)

    # ---- final_layer_norm1(x + v9)
    z = x + v9
    mu2 = jnp.mean(z, axis=-1, keepdims=True)
    zc = z - mu2
    var2 = jnp.mean(zc * zc, axis=-1, keepdims=True)
    o_ref[...] = zc * jax.lax.rsqrt(var2 + EPS) * g2 + be2


# ----------------------------------------------------------------------------
# Wrappers
# ----------------------------------------------------------------------------
def model_forward_rows(x_rows, w_slab, vec_slab):
    """Run the fused forward on (B, D) independent rows (any B >= 1)."""
    B, d = x_rows.shape
    assert d == D
    b8 = -(-B // 8) * 8                      # pad rows to a sublane multiple
    tb = _choose_tb(b8)
    bp = -(-b8 // tb) * tb                   # and to a multiple of the tile
    if bp != B:
        # Zero pad rows are independent; LayerNorm on them gives rsqrt(eps)
        # (finite) and they are sliced off below — benign by construction.
        x_rows = jnp.pad(x_rows, ((0, bp - B), (0, 0)))
    out = pl.pallas_call(
        _fused_rows_kernel,
        out_shape=jax.ShapeDtypeStruct((bp, d), jnp.float32),
        grid=(bp // tb,),
        in_specs=[
            pl.BlockSpec((tb, d), lambda i: (i, 0)),        # x rows (streamed)
            pl.BlockSpec((d, 3 * d), lambda i: (0, 0)),     # bf16 weight slab (resident)
            pl.BlockSpec((8, d), lambda i: (0, 0)),         # f32 vector slab (resident)
        ],
        out_specs=pl.BlockSpec((tb, d), lambda i: (i, 0)),
        compiler_params=pltpu.CompilerParams(
            dimension_semantics=("parallel",)),
    )(x_rows, w_slab, vec_slab)
    return out[:B]


@jax.jit
def model_forward(x, packed):
    """Single-sample forward matching Model.forward: x.view(1,1,-1) -> (1,1,D)."""
    x_flat = x.reshape(1, D).astype(jnp.float32)
    out = model_forward_rows(x_flat, packed["w_slab"], packed["vec_slab"])
    return out.reshape(1, 1, D)


# ----------------------------------------------------------------------------
# Parameter construction
# ----------------------------------------------------------------------------
def init_raw_params(key, d=D):
    """Raw (unfused) parameters in x @ W + b layout, as the PyTorch module holds them."""
    ks = jax.random.split(key, 8)
    s = 0.2
    return {
        "wqkv": s * jax.random.normal(ks[0], (d, 3 * d), jnp.float32),  # packed q,k,v in-proj
        "bqkv": s * jax.random.normal(ks[1], (1, 3 * d), jnp.float32),
        "wo":   s * jax.random.normal(ks[2], (d, d), jnp.float32),       # attn out-proj
        "bo":   s * jax.random.normal(ks[3], (1, d), jnp.float32),
        "w1":   s * jax.random.normal(ks[4], (d, d), jnp.float32),
        "b1":   s * jax.random.normal(ks[5], (1, d), jnp.float32),
        "w2":   s * jax.random.normal(ks[6], (d, d), jnp.float32),
        "b2":   s * jax.random.normal(ks[7], (1, d), jnp.float32),
        "g1":  jnp.ones((1, d), jnp.float32),  "be1": jnp.zeros((1, d), jnp.float32),
        "g2":  jnp.ones((1, d), jnp.float32),  "be2": jnp.zeros((1, d), jnp.float32),
    }


def pack_params(raw, w_dtype=jnp.bfloat16):
    """Fold Wv@Wo at init (exact: seq_len==1 -> softmax==1) in f32, pack into
    2 slabs, and cast only the matmul weight slab to `w_dtype` (default bf16)."""
    d = raw["wo"].shape[0]
    wv = raw["wqkv"][:, 2 * d:3 * d]
    bv = raw["bqkv"][:, 2 * d:3 * d]
    w_attn = wv @ raw["wo"]                     # fold in f32
    b_attn = bv @ raw["wo"] + raw["bo"]
    w_slab = jnp.concatenate([w_attn, raw["w1"], raw["w2"]], axis=1).astype(w_dtype)
    vec_slab = jnp.concatenate(
        [b_attn, raw["b1"], raw["b2"],
         raw["g1"], raw["be1"], raw["g2"], raw["be2"],
         jnp.zeros((1, d), jnp.float32)], axis=0).astype(jnp.float32)      # (8, d)
    return {"w_slab": w_slab, "vec_slab": vec_slab}


# ----------------------------------------------------------------------------
# Pure-JAX references
# ----------------------------------------------------------------------------
def model_forward_ref(x, raw):
    """Original (unfused) forward, incl. the degenerate softmax, all f32."""
    d = D
    x_flat = x.reshape(1, d).astype(jnp.float32)
    qkv = x_flat @ raw["wqkv"] + raw["bqkv"]
    q, k, v = qkv[:, :d], qkv[:, d:2 * d], qkv[:, 2 * d:]
    s = jnp.sum(q * (1.0 / jnp.sqrt(jnp.float32(d))) * k)    # single score (seq_len == 1)
    p = jnp.exp(s - s)                                        # softmax over length-1 axis
    attn = p * v
    v1 = attn @ raw["wo"] + raw["bo"]
    v2 = v1 + 0.5
    v3 = v2 @ raw["w1"] + raw["b1"]
    v4 = jnp.maximum(v3, 0.0)
    v6 = v2 + v4

    def ln(t, g, b):
        mu = jnp.mean(t, axis=-1, keepdims=True)
        var = jnp.mean((t - mu) ** 2, axis=-1, keepdims=True)
        return (t - mu) / jnp.sqrt(var + EPS) * g + b

    v7 = ln(v6, raw["g1"], raw["be1"])
    v9 = jnp.tanh(v7 @ raw["w2"] + raw["b2"])
    v10 = ln(x_flat + v9, raw["g2"], raw["be2"])
    return v10.reshape(1, 1, d)


def model_forward_fused_ref(x_rows, w_slab, vec_slab):
    """Pure-JAX replica of the fused kernel math; matmul operand dtype follows w_slab."""
    d = D
    x = x_rows.astype(jnp.float32)
    mm_dt = w_slab.dtype
    b_attn, b1, b2 = vec_slab[0:1], vec_slab[1:2], vec_slab[2:3]
    g1, be1, g2, be2 = vec_slab[3:4], vec_slab[4:5], vec_slab[5:6], vec_slab[6:7]

    def mm(a, wpart):
        return jnp.dot(a.astype(mm_dt), wpart, preferred_element_type=jnp.float32)

    def ln(t, g, b):
        mu = jnp.mean(t, axis=-1, keepdims=True)
        var = jnp.mean((t - mu) ** 2, axis=-1, keepdims=True)
        return (t - mu) * jax.lax.rsqrt(var + EPS) * g + b

    v1 = mm(x, w_slab[:, 0:d]) + b_attn
    v2 = v1 + 0.5
    v4 = jnp.maximum(mm(v2, w_slab[:, d:2 * d]) + b1, 0.0)
    v6 = v2 + v4
    v7 = ln(v6, g1, be1)
    v9 = jnp.tanh(mm(v7, w_slab[:, 2 * d:3 * d]) + b2)
    return ln(x + v9, g2, be2)


if __name__ == "__main__":
    key = jax.random.PRNGKey(0)
    kx, kp, kb = jax.random.split(key, 3)

    raw = init_raw_params(kp)
    packed = pack_params(raw)                      # bf16 matmul weights (kernel path)
    packed_f32 = pack_params(raw, jnp.float32)     # f32 fold, reference-only

    # Single-sample input: any shape whose flattened size == D (x.view(1,1,-1)).
    x = jax.random.normal(kx, (8, 16), jnp.float32)          # 8*16 = 128 = D
    out = model_forward(x, packed)
    jax.block_until_ready(out)
    assert out.shape == (1, 1, D)

    x_row = x.reshape(1, D)
    # 1) The algebraic fold (softmax==1, attn==v, Wv@Wo folded) is exact in f32.
    assert jnp.allclose(
        model_forward_fused_ref(x_row, packed_f32["w_slab"], packed_f32["vec_slab"]),
        model_forward_ref(x, raw).reshape(1, D), atol=1e-4, rtol=1e-4), "fold mismatch"
    # 2) The kernel matches a pure-JAX replica of the same bf16-operand math.
    assert jnp.allclose(
        out.reshape(1, D),
        model_forward_fused_ref(x_row, packed["w_slab"], packed["vec_slab"]),
        atol=2e-3, rtol=2e-3), "kernel mismatch vs fused bf16 reference (single)"
    # 3) Loose end-to-end sanity vs the original f32 module math (slack = bf16 matmuls).
    assert jnp.allclose(out, model_forward_ref(x, raw), atol=2.5e-1, rtol=2.5e-1)

    # Batched path: 64 independent rows -> tile 32, grid=(2,) "parallel"
    # (>=2 steps keeps both v7x TensorCores busy; larger batches automatically
    #  pick 128/256/512-row MXU-filling tiles).
    xb = jax.random.normal(kb, (64, D), jnp.float32)
    outb = jax.jit(model_forward_rows)(xb, packed["w_slab"], packed["vec_slab"])
    jax.block_until_ready(outb)
    assert jnp.allclose(
        outb, model_forward_fused_ref(xb, packed["w_slab"], packed["vec_slab"]),
        atol=2e-3, rtol=2e-3), "kernel mismatch vs fused bf16 reference (batched)"

    print("KERNEL_OK")
</pallas_src>

<mosaic_0001>
module attributes {stable_mosaic.version = 11 : i64} {
  func.func @_fused_rows_kernel(%arg0: i32, %arg1: memref<8x128xf32, #tpu.memory_space<vmem>>, %arg2: memref<128x384xbf16, #tpu.memory_space<vmem>>, %arg3: memref<8x128xf32, #tpu.memory_space<vmem>>, %arg4: memref<8x128xf32, #tpu.memory_space<vmem>>) attributes {dimension_semantics = [#tpu.dimension_semantics<parallel>], iteration_bounds = array<i64: 1>, scalar_prefetch = 0 : i64, scratch_operands = 0 : i64, tpu.core_type = #tpu.core_type<tc>, window_params = [{transform_indices = @transform_0, window_bounds = array<i64: 8, 128>}, {pipeline_mode = #tpu.pipeline_mode<synchronous>, transform_indices = @transform_1, window_bounds = array<i64: 128, 384>}, {pipeline_mode = #tpu.pipeline_mode<synchronous>, transform_indices = @transform_2, window_bounds = array<i64: 8, 128>}, {transform_indices = @transform_3, window_bounds = array<i64: 8, 128>}]} {
    %c0 = arith.constant 0 : index
    %c0_0 = arith.constant 0 : index
    %0 = vector.load %arg1[%c0, %c0_0] : memref<8x128xf32, #tpu.memory_space<vmem>>, vector<8x128xf32>
    %c0_1 = arith.constant 0 : index
    %c0_2 = arith.constant 0 : index
    %1 = vector.load %arg2[%c0_1, %c0_2] : memref<128x384xbf16, #tpu.memory_space<vmem>>, vector<128x384xbf16>
    %c0_3 = arith.constant 0 : index
    %c0_4 = arith.constant 0 : index
    %2 = vector.load %arg3[%c0_3, %c0_4] : memref<8x128xf32, #tpu.memory_space<vmem>>, vector<8x128xf32>
    %3 = vector.extract_strided_slice %2 {offsets = [0, 0], sizes = [1, 128], strides = [1, 1]} : vector<8x128xf32> to vector<1x128xf32>
    %4 = vector.extract_strided_slice %2 {offsets = [1, 0], sizes = [1, 128], strides = [1, 1]} : vector<8x128xf32> to vector<1x128xf32>
    %5 = vector.extract_strided_slice %2 {offsets = [2, 0], sizes = [1, 128], strides = [1, 1]} : vector<8x128xf32> to vector<1x128xf32>
    %6 = vector.extract_strided_slice %2 {offsets = [3, 0], sizes = [1, 128], strides = [1, 1]} : vector<8x128xf32> to vector<1x128xf32>
    %7 = vector.extract_strided_slice %2 {offsets = [4, 0], sizes = [1, 128], strides = [1, 1]} : vector<8x128xf32> to vector<1x128xf32>
    %8 = vector.extract_strided_slice %2 {offsets = [5, 0], sizes = [1, 128], strides = [1, 1]} : vector<8x128xf32> to vector<1x128xf32>
    %9 = vector.extract_strided_slice %2 {offsets = [6, 0], sizes = [1, 128], strides = [1, 1]} : vector<8x128xf32> to vector<1x128xf32>
    %10 = arith.truncf %0 : vector<8x128xf32> to vector<8x128xbf16>
    %11 = vector.extract_strided_slice %1 {offsets = [0, 0], sizes = [128, 128], strides = [1, 1]} : vector<128x384xbf16> to vector<128x128xbf16>
    %cst = arith.constant dense<0.000000e+00> : vector<8x128xf32>
    %12 = tpu.matmul %10, %11, %cst {dimension_numbers = #tpu.dot_dimension_numbers<[1], [0], [0], [1], [0, 0, 1, 1], [], []>} : vector<8x128xbf16>, vector<128x128xbf16>, vector<8x128xf32> -> vector<8x128xf32>
    %13 = vector.broadcast %3 : vector<1x128xf32> to vector<8x128xf32>
    %14 = arith.addf %12, %13 : vector<8x128xf32>
    %cst_5 = arith.constant 5.000000e-01 : f32
    %15 = vector.broadcast %cst_5 : f32 to vector<8x128xf32>
    %16 = arith.addf %14, %15 : vector<8x128xf32>
    %17 = arith.truncf %16 : vector<8x128xf32> to vector<8x128xbf16>
    %18 = vector.extract_strided_slice %1 {offsets = [0, 128], sizes = [128, 128], strides = [1, 1]} : vector<128x384xbf16> to vector<128x128xbf16>
    %cst_6 = arith.constant dense<0.000000e+00> : vector<8x128xf32>
    %19 = tpu.matmul %17, %18, %cst_6 {dimension_numbers = #tpu.dot_dimension_numbers<[1], [0], [0], [1], [0, 0, 1, 1], [], []>} : vector<8x128xbf16>, vector<128x128xbf16>, vector<8x128xf32> -> vector<8x128xf32>
    %20 = vector.broadcast %4 : vector<1x128xf32> to vector<8x128xf32>
    %21 = arith.addf %19, %20 : vector<8x128xf32>
    %cst_7 = arith.constant 0.000000e+00 : f32
    %22 = vector.broadcast %cst_7 : f32 to vector<8x128xf32>
    %23 = arith.maximumf %21, %22 : vector<8x128xf32>
    %24 = arith.addf %16, %23 : vector<8x128xf32>
    %cst_8 = arith.constant dense<0.000000e+00> : vector<8xf32>
    %25 = vector.multi_reduction <add>, %24, %cst_8 [1] : vector<8x128xf32> to vector<8xf32>
    %26 = vector.shape_cast %25 : vector<8xf32> to vector<8x1xf32>
    %cst_9 = arith.constant 1.280000e+02 : f32
    %27 = vector.broadcast %cst_9 : f32 to vector<8x1xf32>
    %28 = arith.divf %26, %27 : vector<8x1xf32>
    %29 = vector.broadcast %28 : vector<8x1xf32> to vector<8x128xf32>
    %30 = arith.subf %24, %29 : vector<8x128xf32>
    %31 = arith.mulf %30, %30 : vector<8x128xf32>
    %cst_10 = arith.constant dense<0.000000e+00> : vector<8xf32>
    %32 = vector.multi_reduction <add>, %31, %cst_10 [1] : vector<8x128xf32> to vector<8xf32>
    %33 = vector.shape_cast %32 : vector<8xf32> to vector<8x1xf32>
    %cst_11 = arith.constant 1.280000e+02 : f32
    %34 = vector.broadcast %cst_11 : f32 to vector<8x1xf32>
    %35 = arith.divf %33, %34 : vector<8x1xf32>
    %cst_12 = arith.constant 9.99999974E-6 : f32
    %36 = vector.broadcast %cst_12 : f32 to vector<8x1xf32>
    %37 = arith.addf %35, %36 : vector<8x1xf32>
    %38 = math.rsqrt %37 : vector<8x1xf32>
    %39 = vector.broadcast %38 : vector<8x1xf32> to vector<8x128xf32>
    %40 = arith.mulf %30, %39 : vector<8x128xf32>
    %41 = vector.broadcast %6 : vector<1x128xf32> to vector<8x128xf32>
    %42 = arith.mulf %40, %41 : vector<8x128xf32>
    %43 = vector.broadcast %7 : vector<1x128xf32> to vector<8x128xf32>
    %44 = arith.addf %42, %43 : vector<8x128xf32>
    %45 = arith.truncf %44 : vector<8x128xf32> to vector<8x128xbf16>
    %46 = vector.extract_strided_slice %1 {offsets = [0, 256], sizes = [128, 128], strides = [1, 1]} : vector<128x384xbf16> to vector<128x128xbf16>
    %cst_13 = arith.constant dense<0.000000e+00> : vector<8x128xf32>
    %47 = tpu.matmul %45, %46, %cst_13 {dimension_numbers = #tpu.dot_dimension_numbers<[1], [0], [0], [1], [0, 0, 1, 1], [], []>} : vector<8x128xbf16>, vector<128x128xbf16>, vector<8x128xf32> -> vector<8x128xf32>
    %48 = vector.broadcast %5 : vector<1x128xf32> to vector<8x128xf32>
    %49 = arith.addf %47, %48 : vector<8x128xf32>
    %50 = math.tanh %49 : vector<8x128xf32>
    %51 = arith.addf %0, %50 : vector<8x128xf32>
    %cst_14 = arith.constant dense<0.000000e+00> : vector<8xf32>
    %52 = vector.multi_reduction <add>, %51, %cst_14 [1] : vector<8x128xf32> to vector<8xf32>
    %53 = vector.shape_cast %52 : vector<8xf32> to vector<8x1xf32>
    %cst_15 = arith.constant 1.280000e+02 : f32
    %54 = vector.broadcast %cst_15 : f32 to vector<8x1xf32>
    %55 = arith.divf %53, %54 : vector<8x1xf32>
    %56 = vector.broadcast %55 : vector<8x1xf32> to vector<8x128xf32>
    %57 = arith.subf %51, %56 : vector<8x128xf32>
    %58 = arith.mulf %57, %57 : vector<8x128xf32>
    %cst_16 = arith.constant dense<0.000000e+00> : vector<8xf32>
    %59 = vector.multi_reduction <add>, %58, %cst_16 [1] : vector<8x128xf32> to vector<8xf32>
    %60 = vector.shape_cast %59 : vector<8xf32> to vector<8x1xf32>
    %cst_17 = arith.constant 1.280000e+02 : f32
    %61 = vector.broadcast %cst_17 : f32 to vector<8x1xf32>
    %62 = arith.divf %60, %61 : vector<8x1xf32>
    %cst_18 = arith.constant 9.99999974E-6 : f32
    %63 = vector.broadcast %cst_18 : f32 to vector<8x1xf32>
    %64 = arith.addf %62, %63 : vector<8x1xf32>
    %65 = math.rsqrt %64 : vector<8x1xf32>
    %66 = vector.broadcast %65 : vector<8x1xf32> to vector<8x128xf32>
    %67 = arith.mulf %57, %66 : vector<8x128xf32>
    %68 = vector.broadcast %8 : vector<1x128xf32> to vector<8x128xf32>
    %69 = arith.mulf %67, %68 : vector<8x128xf32>
    %70 = vector.broadcast %9 : vector<1x128xf32> to vector<8x128xf32>
    %71 = arith.addf %69, %70 : vector<8x128xf32>
    %c0_19 = arith.constant 0 : index
    %c0_20 = arith.constant 0 : index
    %72 = vector.load %arg4[%c0_19, %c0_20] : memref<8x128xf32, #tpu.memory_space<vmem>>, vector<8x128xf32>
    tpu.vector_store %arg4[%c0_19, %c0_20], %71 {strides = array<i32>} : memref<8x128xf32, #tpu.memory_space<vmem>>, vector<8x128xf32>,
    return
  }
  func.func @transform_0(%arg0: i32) -> (i32, i32) {
    %c0_i32 = arith.constant 0 : i32
    %c0_i32_0 = arith.constant 0 : i32
    return %arg0, %c0_i32 : i32, i32
  }
  func.func @transform_1(%arg0: i32) -> (i32, i32) {
    %c0_i32 = arith.constant 0 : i32
    %c0_i32_0 = arith.constant 0 : i32
    %c0_i32_1 = arith.constant 0 : i32
    return %c0_i32, %c0_i32_0 : i32, i32
  }
  func.func @transform_2(%arg0: i32) -> (i32, i32) {
    %c0_i32 = arith.constant 0 : i32
    %c0_i32_0 = arith.constant 0 : i32
    %c0_i32_1 = arith.constant 0 : i32
    return %c0_i32, %c0_i32_0 : i32, i32
  }
  func.func @transform_3(%arg0: i32) -> (i32, i32) {
    %c0_i32 = arith.constant 0 : i32
    %c0_i32_0 = arith.constant 0 : i32
    return %arg0, %c0_i32 : i32, i32
  }
}

</mosaic_0001>

<bundles_post_ra>
// kernel: model_forward.1
= control target key start
LH: loop header
LB: loop body
LE: loop exit
PB: predicated region body
PF: predicated region fallthrough
CT: control target
= control target key end

     0   :  { %8 = vsyncpa [#allocation3], 0  ;;  %s461_s15 = smov [#allocation2]   ;;  %s462_s17 = smov 192   ;;  %s517_s0 = inlined_call_operand.vmem [shape: f32[8,128], index: 0, kind: input, shape index: {}]   ;;  %s518_s1 = inlined_call_operand.hbm [shape: bf16[128,384], index: 1, kind: input, shape index: {}]   ;;  %s519_s2 = inlined_call_operand.vmem [shape: f32[8,128], index: 2, kind: input, shape index: {}]   ;;  %s520_s3 = inlined_call_operand.vmem [shape: f32[8,128], index: 3, kind: output, shape index: {}]  }
   0x1   :  { %s15_s14 = sshll.u32 %s518_s1, 4  ;;  %s17_s16 = sshll.u32 %s461_s15, 4  ;;  %s16_s14 = int_to_ptr.hbm [resolvable:$true] %s15_s14  ;;  %s18_s16 = int_to_ptr.vmem [resolvable:$true] %s17_s16 }
   0x2   :  { %s463_s18 = smov 12  }
   0x3   :  { %23 = dma.hbm_to_vmem [thread:$0]  %s16_s14, 3072, %s18_s16, [#allocation3], %s462_s17, %s462_s17, %s463_s18  }
   0x4   :  { %459 = dma.done.wait [#allocation3], 3072  }
   0x5   :  { %460 = vsyncadd [#allocation3], 4294964224  ;;  %v333_v0 = vld [vmem:[#allocation2 + $0xa8] sm:$0xf]  ;;  %v421_v1 = vld [vmem:[#allocation2 + $0xb0] sm:$0xf0] }
   0x6   :  { %v329_v2 = vld [vmem:[#allocation2 + $0x90] sm:$0xf]  ;;  %v334_v3 = vor.u32 %v421_v1, %v333_v0  ;;  %v418_v4 = vld [vmem:[#allocation2 + $0x98] sm:$0xf0]  ;;  %v325_v6 = vld [vmem:[#allocation2 + $0x78] sm:$0xf] }
   0x7   :  { %v330_v5 = vor.u32 %v418_v4, %v329_v2  ;;  %v415_v7 = vld [vmem:[#allocation2 + $0x80] sm:$0xf0]  ;;  %v420_v8 = vld [vmem:[#allocation2 + $0xac] sm:$0xf]  ;;  %v363_v9 = vld [vmem:[#allocation2 + $0xb4] sm:$0xf0] }
   0x8   :  { %114 = vmatpush.bf16.msra.mxu0 %v334_v3  ;;  %v417_v10 = vld [vmem:[#allocation2 + $0x94] sm:$0xf]  ;;  %v359_v11 = vld [vmem:[#allocation2 + $0x9c] sm:$0xf0]  ;;  %v326_v12 = vor.u32 %v415_v7, %v325_v6  ;;  %v366_v13 = vor.u32 %v420_v8, %v363_v9  ;;  %v412_v15 = vld [vmem:[#allocation2 + $0x68] sm:$0xf0] }
   0x9   :  { %v321_v14 = vld [vmem:[#allocation2 + $0x60] sm:$0xf]  ;;  %v362_v16 = vor.u32 %v417_v10, %v359_v11  ;;  %v414_v17 = vld [vmem:[#allocation2 + $0x7c] sm:$0xf]  ;;  %v355_v18 = vld [vmem:[#allocation2 + $0x84] sm:$0xf0] }
   0xa   :  { %162 = vmatpush.bf16.msra.mxu1 %v366_v13  ;;  %v322_v19 = vor.u32 %v412_v15, %v321_v14  ;;  %v317_v20 = vld [vmem:[#allocation2 + $0x48] sm:$0xf]  ;;  %v409_v21 = vld [vmem:[#allocation2 + $0x50] sm:$0xf0]  ;;  %v358_v22 = vor.u32 %v414_v17, %v355_v18  ;;  %v411_v23 = vld [vmem:[#allocation2 + $0x64] sm:$0xf] }
   0xb   :  { %v351_v24 = vld [vmem:[#allocation2 + $0x6c] sm:$0xf0]  ;;  %v318_v25 = vor.u32 %v409_v21, %v317_v20  ;;  %v406_v27 = vld [vmem:[#allocation2 + $0x38] sm:$0xf0]  ;;  %v408_v29 = vld [vmem:[#allocation2 + $0x4c] sm:$0xf] }
   0xc   :  { %115 = vmatpush.bf16.msra.mxu0 %v330_v5  ;;  %v313_v26 = vld [vmem:[#allocation2 + $0x30] sm:$0xf]  ;;  %v354_v28 = vor.u32 %v411_v23, %v351_v24  ;;  %v347_v30 = vld [vmem:[#allocation2 + $0x54] sm:$0xf0]  ;;  %v403_v33 = vld [vmem:[#allocation2 + $0x20] sm:$0xf0] }
   0xd   :  { %v314_v31 = vor.u32 %v406_v27, %v313_v26  ;;  %v309_v32 = vld [vmem:[#allocation2 + $0x18] sm:$0xf]  ;;  %v350_v34 = vor.u32 %v408_v29, %v347_v30  ;;  %v405_v35 = vld [vmem:[#allocation2 + $0x34] sm:$0xf]  ;;  %v343_v36 = vld [vmem:[#allocation2 + $0x3c] sm:$0xf0] }
   0xe   :  { %163 = vmatpush.bf16.msra.mxu1 %v362_v16  ;;  %v310_v37 = vor.u32 %v403_v33, %v309_v32  ;;  %v305_v38 = vld [vmem:[#allocation2] sm:$0xf]  ;;  %v400_v39 = vld [vmem:[#allocation2 + $0x8] sm:$0xf0]  ;;  %v346_v40 = vor.u32 %v405_v35, %v343_v36  ;;  %v402_v44 = vld [vmem:[#allocation2 + $0x1c] sm:$0xf] }
   0xf   :  { %v306_v41 = vor.u32 %v400_v39, %v305_v38  ;;  %v491_v42 = vld [vmem:[%s517_s0] sm:$0xff]  ;;  %v339_v45 = vld [vmem:[#allocation2 + $0x24] sm:$0xf0]  ;;  %v335_v48 = vld [vmem:[#allocation2 + $0xc] sm:$0xf0]  ;;  %v464_v63 = vmov 128.0  }
  0x10   :  { %116 = vmatpush.bf16.msra.mxu0 %v326_v12  ;;  %v64_v43 = vpack.c.bf16 %v491_v42, %v491_v42  ;;  %v342_v46 = vor.u32 %v402_v44, %v339_v45  ;;  %v399_v47 = vld [vmem:[#allocation2 + $0x4] sm:$0xf]  ;;  %427 = vrcp.f32 %v464_v63  ;;  %v397_v0 = vld [vmem:[#allocation2 + $0xb0] sm:$0xf]  ;;  %v422_v1 = vld [vmem:[#allocation2 + $0xb8] sm:$0xf0] }
  0x11   :  { %v338_v49 = vor.u32 %v399_v47, %v335_v48  ;;  %v498_v50 = vld [vmem:[%s519_s2] sm:$0xff]  ;;  %v398_v2 = vor.u32 %v422_v1, %v397_v0  ;;  %v393_v13 = vld [vmem:[#allocation2 + $0x98] sm:$0xf]  ;;  %v416_v17 = vld [vmem:[#allocation2 + $0x88] sm:$0xf0] }
  0x12   :  { %164 = vmatpush.bf16.msra.mxu1 %v358_v22  ;;  %v65_v51 = vperm.slane %v498_v50, 0  ;;  %v129_v57 = vperm.slane %v498_v50, 1  ;;  %v419_v14 = vld [vmem:[#allocation2 + $0xa0] sm:$0xf0]  ;;  %v389_v16 = vld [vmem:[#allocation2 + $0x80] sm:$0xf] }
  0x13   :  { %258 = vmatpush.bf16.msra.mxu2 %v398_v2  ;;  %v394_v15 = vor.u32 %v419_v14, %v393_v13  ;;  %v390_v18 = vor.u32 %v416_v17, %v389_v16  ;;  %v413_v20 = vld [vmem:[#allocation2 + $0x70] sm:$0xf0]  ;;  %v381_v22 = vld [vmem:[#allocation2 + $0x50] sm:$0xf]  ;;  %v410_v23 = vld [vmem:[#allocation2 + $0x58] sm:$0xf0] }
  0x14   :  { %117 = vmatpush.bf16.msra.mxu0 %v322_v19  ;;  %v385_v19 = vld [vmem:[#allocation2 + $0x68] sm:$0xf]  ;;  %v382_v24 = vor.u32 %v410_v23, %v381_v22  ;;  %v407_v26 = vld [vmem:[#allocation2 + $0x40] sm:$0xf0]  ;;  %v404_v29 = vld [vmem:[#allocation2 + $0x28] sm:$0xf0] }
  0x15   :  { %v386_v21 = vor.u32 %v413_v20, %v385_v19  ;;  %v401_v32 = vld [vmem:[#allocation2 + $0x10] sm:$0xf0]  ;;  %v204_v44 = vperm.slane %v498_v50, 3  ;;  %v206_v47 = vperm.slane %v498_v50, 4 }
  0x16   :  { %165 = vmatpush.bf16.msra.mxu1 %v354_v28  ;;  %v428_v3 = vpop.eup %427  ;;  %v373_v28 = vld [vmem:[#allocation2 + $0x20] sm:$0xf] }
  0x17   :  { %v180_v4 = vmul.f32 128.0, %v428_v3  ;;  %vm184_vm0 = vweird.f32 %v428_v3  ;;  %259 = vmatpush.bf16.msra.mxu2 %v394_v15  ;;  %v374_v30 = vor.u32 %v404_v29, %v373_v28 }
  0x18   :  { %118 = vmatpush.bf16.msra.mxu0 %v318_v25  ;;  %v377_v25 = vld [vmem:[#allocation2 + $0x38] sm:$0xf] }
  0x19   :  { %v181_v5 = vsub.f32 1.0, %v180_v4  ;;  %v378_v27 = vor.u32 %v407_v26, %v377_v25 }
  0x1a   :  { %166 = vmatpush.bf16.msra.mxu1 %v350_v34 }
  0x1b   :  { %v182_v6 = vmul.f32 %v428_v3, %v181_v5  ;;  %260 = vmatpush.bf16.msra.mxu2 %v390_v18 }
  0x1c   :  { %119 = vmatpush.bf16.msra.mxu0 %v314_v31  ;;  %v369_v31 = vld [vmem:[#allocation2 + $0x8] sm:$0xf] }
  0x1d   :  { %v183_v7 = vadd.f32 %v428_v3, %v182_v6  ;;  %v370_v33 = vor.u32 %v401_v32, %v369_v31 }
  0x1e   :  { %167 = vmatpush.bf16.msra.mxu1 %v346_v40 }
  0x1f   :  { %v502_v8 = vsel %vm184_vm0, %v428_v3, %v183_v7  ;;  %261 = vmatpush.bf16.msra.mxu2 %v386_v21 }
  0x20   :  { %120 = vmatpush.bf16.msra.mxu0 %v310_v37 }
  0x22   :  { %168 = vmatpush.bf16.msra.mxu1 %v342_v46 }
  0x23   :  { %262 = vmatpush.bf16.msra.mxu2 %v382_v24 }
  0x24   :  { %121 = vmatpush.bf16.msra.mxu0 %v306_v41 }
  0x26   :  { %169 = vmatpush.bf16.msra.mxu1 %v338_v49 }
  0x27   :  { %122 = vmatmul.bf16.vlgmr.msra.gmra.mxu0 %v64_v43  ;;  %263 = vmatpush.bf16.msra.mxu2 %v378_v27 }
  0x2b   :  { %264 = vmatpush.bf16.msra.mxu2 %v374_v30 }
  0x2f   :  { %265 = vmatpush.bf16.msra.mxu2 %v370_v33 }
  0xa4   :  { %v123_v52 = vpop.f32.mrf.mxu0 }
  0xa5   :  { %v124_v53 = vadd.f32 %v123_v52, %v65_v51  ;;  %v209_v52 = vperm.slane %v498_v50, 2 }
  0xa7   :  { %v127_v54 = vadd.f32 0.5, %v124_v53 }
  0xa9   :  { %v128_v55 = vpack.c.bf16 %v127_v54, %v127_v54 }
  0xab   :  { %170 = vmatmul.bf16.vlgmr.msra.gmra.mxu1 %v128_v55 }
  0xac   :  { %v125_v56 = vpop.f32.mrf.mxu0 }
 0x128   :  { %v171_v58 = vpop.f32.mrf.mxu1 }
 0x129   :  { %v172_v59 = vadd.f32 %v171_v58, %v129_v57 }
 0x12b   :  { %v175_v60 = vmax.f32 %v172_v59, 0.0 }
 0x12d   :  { %v176_v61 = vadd.f32 %v175_v60, %v127_v54 }
 0x12f   :  { %177 = vadd.xlane.f32.xlu0 %v176_v61 }
 0x130   :  { %v173_v62 = vpop.f32.mrf.mxu1 }
 0x1a2   :  { %v178_v9 = vpop.xlane.xlu0 %177 }
 0x1a3   :  { %v186_v10 = vmul.f32 %v502_v8, %v178_v9  ;;  %v295_v9 = vperm.slane %v498_v50, 6 }
 0x1a5   :  { %v187_v11 = vsub.f32 %v176_v61, %v186_v10 }
 0x1a7   :  { %v188_v12 = vmul.f32 %v187_v11, %v187_v11 }
 0x1a9   :  { %189 = vadd.xlane.f32.xlu0 %v188_v12 }
 0x21c   :  { %v190_v34 = vpop.xlane.xlu0 %189 }
 0x21d   :  { %v191_v35 = vmul.f32 %v190_v34, %v502_v8 }
 0x21f   :  { %v192_v36 = vadd.f32 1e-05, %v191_v35 }
 0x221   :  { %429 = vrsqrt.f32 %v192_v36  ;;  %vm199_vm2 = vweird.f32 %v192_v36 }
 0x227   :  { %v430_v37 = vpop.eup %429 }
 0x228   :  { %v194_v38 = vmul.f32 %v430_v37, %v192_v36  ;;  %vm200_vm1 = vweird.f32 %v430_v37 }
 0x229   :  { %vm201_vm3 = vmor %vm199_vm2, %vm200_vm1 }
 0x22a   :  { %v195_v39 = vmul.f32 %v430_v37, %v194_v38 }
 0x22c   :  { %v196_v40 = vmul.f32 0.5, %v195_v39 }
 0x22e   :  { %v197_v41 = vsub.f32 1.5, %v196_v40 }
 0x230   :  { %v198_v43 = vmul.f32 %v430_v37, %v197_v41 }
 0x232   :  { %v202_v45 = vsel %vm201_vm3, %v430_v37, %v198_v43 }
 0x233   :  { %v203_v46 = vmul.f32 %v202_v45, %v187_v11 }
 0x235   :  { %v205_v48 = vmul.f32 %v204_v44, %v203_v46 }
 0x237   :  { %v207_v49 = vadd.f32 %v206_v47, %v205_v48 }
 0x239   :  { %v208_v51 = vpack.c.bf16 %v207_v49, %v207_v49 }
 0x23b   :  { %266 = vmatmul.bf16.vlgmr.msra.gmra.mxu2 %v208_v51 }
 0x2be   :  { %v267_v53 = vpop.f32.mrf.mxu2 }
 0x2bf   :  { %v268_v54 = vadd.f32 %v267_v53, %v209_v52 }
 0x2c1   :  { %431 = vtanh.f32 %v268_v54 }
 0x2c6   :  { %v269_v55 = vpop.f32.mrf.mxu2 }
 0x2c7   :  { %v432_v56 = vpop.eup %431 }
 0x2c8   :  { %v272_v57 = vadd.f32 %v432_v56, %v491_v42  ;;  %v293_v42 = vperm.slane %v498_v50, 5 }
 0x2ca   :  { %273 = vadd.xlane.f32.xlu1 %v272_v57 }
 0x33d   :  { %v274_v58 = vpop.xlane.xlu1 %273 }
 0x33e   :  { %v275_v59 = vmul.f32 %v274_v58, %v502_v8 }
 0x340   :  { %v276_v60 = vsub.f32 %v272_v57, %v275_v59 }
 0x342   :  { %v277_v61 = vmul.f32 %v276_v60, %v276_v60 }
 0x344   :  { %278 = vadd.xlane.f32.xlu1 %v277_v61 }
 0x3b7   :  { %v279_v62 = vpop.xlane.xlu1 %278 }
 0x3b8   :  { %v280_v63 = vmul.f32 %v279_v62, %v502_v8 }
 0x3ba   :  { %v281_v0 = vadd.f32 1e-05, %v280_v63 }
 0x3bc   :  { %433 = vrsqrt.f32 %v281_v0  ;;  %vm288_vm5 = vweird.f32 %v281_v0 }
 0x3c2   :  { %v434_v1 = vpop.eup %433 }
 0x3c3   :  { %v283_v2 = vmul.f32 %v434_v1, %v281_v0  ;;  %vm289_vm4 = vweird.f32 %v434_v1 }
 0x3c4   :  { %vm290_vm6 = vmor %vm288_vm5, %vm289_vm4 }
 0x3c5   :  { %v284_v3 = vmul.f32 %v434_v1, %v283_v2 }
 0x3c7   :  { %v285_v4 = vmul.f32 0.5, %v284_v3 }
 0x3c9   :  { %v286_v5 = vsub.f32 1.5, %v285_v4 }
 0x3cb   :  { %v287_v6 = vmul.f32 %v434_v1, %v286_v5 }
 0x3cd   :  { %v291_v7 = vsel %vm290_vm6, %v434_v1, %v287_v6 }
 0x3ce   :  { %v292_v10 = vmul.f32 %v291_v7, %v276_v60 }
 0x3d0   :  { %v294_v11 = vmul.f32 %v293_v42, %v292_v10 }
 0x3d2   :  { %v296_v12 = vadd.f32 %v295_v9, %v294_v11 }
 0x3d4   :  { %297 = vst [vmem:[%s520_s3] sm:$0xff] %v296_v12 }
 0x3d5   :  { %302 = vsyncpa [#allocation3], 1 }

</bundles_post_ra>
